<compile_context>
chip_gen: v7x
topology: tpu7x:2x2x1
jax: 0.10.0
libtpu: 0.0.40
codegen_flags: <defaults>
</compile_context>

<pallas_src>
import functools

import jax
import jax.numpy as jnp
from jax import lax
from jax.experimental import pallas as pl
from jax.experimental.pallas import tpu as pltpu


def _cdiv(a: int, b: int) -> int:
    return -(-a // b)


def _round_up(a: int, b: int) -> int:
    return _cdiv(a, b) * b


def _sublane_multiple(dtype) -> int:
    # f32 -> 8, bf16/f16 -> 16, int8/fp8 -> 32 (sub-32-bit dtypes pack along sublanes).
    itemsize = jnp.dtype(dtype).itemsize
    return max(8, 32 // max(1, itemsize))


def _tpu_budget():
    """Generation-aware (target block bytes, min grid steps, VMEM capacity)."""
    vmem_cap = 128 << 20
    try:
        info = pltpu.get_tpu_info()
        vmem_cap = int(getattr(info, "vmem_capacity_bytes", vmem_cap))
    except Exception:
        pass
    if vmem_cap <= (64 << 20):      # v7x-like: 64 MiB VMEM per TensorCore, 2 TCs
        return 2 << 20, 8, vmem_cap
    return 4 << 20, 4, vmem_cap     # v5e / v6e: 128 MiB VMEM, single TC


def _choose_blocks(N: int, C: int, HW: int, dtype, *, target_bytes: int, min_steps: int):
    """Pick (block_n, block_hw).

    block_hw is a multiple of 128 (or the full HW extent); block_n > 1 only when
    block_hw == HW (fully contiguous HBM blocks).  Real VMEM footprint uses C
    rounded up to the sublane multiple and block_hw rounded up to 128 lanes.
    """
    itemsize = jnp.dtype(dtype).itemsize
    c_pad = _round_up(C, _sublane_multiple(dtype))

    def block_bytes(bn: int, bhw: int) -> int:
        return bn * c_pad * _round_up(bhw, 128) * itemsize

    per_image = block_bytes(1, HW)
    if per_image <= target_bytes:
        block_hw = HW
        block_n = max(1, min(N, target_bytes // per_image))
    else:
        block_n = 1
        lanes = max(1, target_bytes // (c_pad * itemsize))
        block_hw = min(HW, max(128, (lanes // 128) * 128))

    def steps(bn: int, bhw: int) -> int:
        return _cdiv(N, bn) * _cdiv(HW, bhw)

    # Guarantee enough grid steps for pipelining (and TC sharding on v7x).
    while steps(block_n, block_hw) < min_steps:
        if block_n > 1:
            block_n = _cdiv(block_n, 2)
        elif block_hw > 128:
            new_hw = max(128, ((block_hw // 2) // 128) * 128)
            if new_hw == block_hw:
                break
            block_hw = new_hw
        else:
            break
    return block_n, block_hw


def _vmem_limit_bytes(block_n: int, C: int, block_hw: int, dtype, vmem_cap: int) -> int:
    itemsize = jnp.dtype(dtype).itemsize
    c_pad = _round_up(C, _sublane_multiple(dtype))
    blk_elems = block_n * c_pad * _round_up(block_hw, 128)
    io = 2 * 2 * blk_elems * itemsize     # double-buffered input + output blocks
    temps = 2 * blk_elems * 4             # f32 upcast + diff (worst-case live set)
    limit = io + temps + (4 << 20)        # headroom: gamma/beta + Mosaic internal scratch
    limit = _round_up(limit, 1 << 20)
    limit = min(limit, (vmem_cap * 3) // 4)   # never over-reserve physical VMEM
    limit = max(limit, 16 << 20)
    return int(limit)


def _chan_ln_kernel(gamma_ref, beta_ref, x_ref, o_ref, *, eps: float, num_channels: int):
    # x_ref / o_ref: (block_n, C, block_hw); gamma_ref / beta_ref: (C, 1).
    x = x_ref[...].astype(jnp.float32)                     # (bn, C, bhw)
    mean = jnp.mean(x, axis=1, keepdims=True)              # (bn, 1, bhw)
    diff = x - mean                                        # x is dead after this line
    # torch.var default is UNBIASED (divide by C-1).  NOTE: C == 1 gives 0/0 -> NaN,
    # matching torch.var's behavior for a single sample.
    var = jnp.sum(diff * diff, axis=1, keepdims=True) / jnp.float32(num_channels - 1)
    inv_std = lax.rsqrt(var + jnp.float32(eps))            # EUP rsqrt (free slot)
    gamma = gamma_ref[...].astype(jnp.float32)             # (C, 1) broadcasts over (bn, C, bhw)
    beta = beta_ref[...].astype(jnp.float32)
    o_ref[...] = (gamma * (diff * inv_std) + beta).astype(o_ref.dtype)


def channel_layer_norm_2d(x, gamma, beta, *, eps: float = 1e-5,
                          block_n: int | None = None, block_hw: int | None = None):
    """x: (N, C, H, W); gamma, beta: (1, C, 1, 1). Returns (N, C, H, W)."""
    N, C, H, W = x.shape
    HW = H * W
    x3d = x.reshape(N, C, HW)                 # contiguous view: no data movement

    target_bytes, min_steps, vmem_cap = _tpu_budget()
    bn_auto, bhw_auto = _choose_blocks(N, C, HW, x.dtype,
                                       target_bytes=target_bytes, min_steps=min_steps)
    if block_n is None:
        block_n = bn_auto
    if block_hw is None:
        block_hw = bhw_auto

    gamma2d = gamma.reshape(C, 1)
    beta2d = beta.reshape(C, 1)

    grid_n = _cdiv(N, block_n)
    grid_hw = _cdiv(HW, block_hw)

    # Put the axis with the most steps first so core-level parallelism (v7x) has
    # something to split; both axes are embarrassingly parallel.
    if grid_hw >= grid_n:
        grid = (grid_hw, grid_n)
        x_idx = lambda j, n: (n, 0, j)
    else:
        grid = (grid_n, grid_hw)
        x_idx = lambda n, j: (n, 0, j)
    param_idx = lambda *_: (0, 0)

    itemsize = jnp.dtype(x.dtype).itemsize
    cost = pl.CostEstimate(
        flops=8 * N * C * HW,
        transcendentals=N * HW,
        bytes_accessed=2 * N * C * HW * itemsize + 2 * C * itemsize,
    )

    kernel = functools.partial(_chan_ln_kernel, eps=eps, num_channels=C)

    out3d = pl.pallas_call(
        kernel,
        out_shape=jax.ShapeDtypeStruct((N, C, HW), x.dtype),
        grid=grid,
        in_specs=[
            pl.BlockSpec((C, 1), param_idx),                  # gamma (resident)
            pl.BlockSpec((C, 1), param_idx),                  # beta  (resident)
            pl.BlockSpec((block_n, C, block_hw), x_idx),      # x tile
        ],
        out_specs=pl.BlockSpec((block_n, C, block_hw), x_idx),
        compiler_params=pltpu.CompilerParams(
            dimension_semantics=("parallel", "parallel"),
            vmem_limit_bytes=_vmem_limit_bytes(block_n, C, block_hw, x.dtype, vmem_cap),
        ),
        cost_estimate=cost,
    )(gamma2d, beta2d, x3d)

    return out3d.reshape(N, C, H, W)


def _reference(x, gamma, beta, eps=1e-5):
    xf = x.astype(jnp.float32)
    mean = jnp.mean(xf, axis=1, keepdims=True)
    var = jnp.sum((xf - mean) ** 2, axis=1, keepdims=True) / (x.shape[1] - 1)
    return (gamma * (xf - mean) / jnp.sqrt(var + eps) + beta).astype(x.dtype)


if __name__ == "__main__":
    key = jax.random.PRNGKey(0)
    k_x, k_g, k_b, k_x2, k_x3 = jax.random.split(key, 5)

    # Case 1: module-default parameters (ones / zeros).
    N, C, H, W = 2, 4, 16, 16
    x = jax.random.normal(k_x, (N, C, H, W), dtype=jnp.float32)
    gamma = jnp.ones((1, C, 1, 1), dtype=jnp.float32)
    beta = jnp.zeros((1, C, 1, 1), dtype=jnp.float32)

    out = jax.block_until_ready(channel_layer_norm_2d(x, gamma, beta, eps=1e-5))
    ref = _reference(x, gamma, beta, eps=1e-5)
    assert out.shape == (N, C, H, W)
    assert jnp.allclose(out, ref, atol=1e-5, rtol=1e-5), "mismatch vs reference (case 1)"

    # Case 2: non-trivial gamma/beta, ragged last spatial block (HW=480, block_hw=128).
    N2, C2, H2, W2 = 2, 4, 24, 20
    x2 = jax.random.normal(k_x2, (N2, C2, H2, W2), dtype=jnp.float32)
    gamma2 = jax.random.normal(k_g, (1, C2, 1, 1), dtype=jnp.float32)
    beta2 = jax.random.normal(k_b, (1, C2, 1, 1), dtype=jnp.float32)

    out2 = jax.block_until_ready(
        channel_layer_norm_2d(x2, gamma2, beta2, eps=1e-5, block_hw=128)
    )
    ref2 = _reference(x2, gamma2, beta2, eps=1e-5)
    assert out2.shape == (N2, C2, H2, W2)
    assert jnp.allclose(out2, ref2, atol=1e-5, rtol=1e-5), "mismatch vs reference (case 2)"

    # Case 3: small spatial extent -> exercises batch (N) blocking with block_n > 1.
    N3, C3, H3, W3 = 8, 8, 8, 8
    x3 = jax.random.normal(k_x3, (N3, C3, H3, W3), dtype=jnp.float32)
    gamma3 = jnp.ones((1, C3, 1, 1), dtype=jnp.float32)
    beta3 = jnp.zeros((1, C3, 1, 1), dtype=jnp.float32)

    out3 = jax.block_until_ready(channel_layer_norm_2d(x3, gamma3, beta3, eps=1e-5))
    ref3 = _reference(x3, gamma3, beta3, eps=1e-5)
    assert out3.shape == (N3, C3, H3, W3)
    assert jnp.allclose(out3, ref3, atol=1e-5, rtol=1e-5), "mismatch vs reference (case 3)"

    print("KERNEL_OK")
</pallas_src>

<mosaic_0001>
module attributes {stable_mosaic.version = 11 : i64} {
  func.func @_chan_ln_kernel(%arg0: i32, %arg1: i32, %arg2: memref<4x1xf32, #tpu.memory_space<vmem>>, %arg3: memref<4x1xf32, #tpu.memory_space<vmem>>, %arg4: memref<1x4x128xf32, #tpu.memory_space<vmem>>, %arg5: memref<1x4x128xf32, #tpu.memory_space<vmem>>) attributes {dimension_semantics = [#tpu.dimension_semantics<parallel>, #tpu.dimension_semantics<parallel>], iteration_bounds = array<i64: 2, 2>, scalar_prefetch = 0 : i64, scratch_operands = 0 : i64, tpu.core_type = #tpu.core_type<tc>, window_params = [{pipeline_mode = #tpu.pipeline_mode<synchronous>, transform_indices = @transform_0, window_bounds = array<i64: 4, 1>}, {pipeline_mode = #tpu.pipeline_mode<synchronous>, transform_indices = @transform_1, window_bounds = array<i64: 4, 1>}, {transform_indices = @transform_2, window_bounds = array<i64: 1, 4, 128>}, {transform_indices = @transform_3, window_bounds = array<i64: 1, 4, 128>}]} {
    %c0 = arith.constant 0 : index
    %c0_0 = arith.constant 0 : index
    %c0_1 = arith.constant 0 : index
    %0 = vector.load %arg4[%c0, %c0_0, %c0_1] : memref<1x4x128xf32, #tpu.memory_space<vmem>>, vector<1x4x128xf32>
    %cst = arith.constant dense<0.000000e+00> : vector<1x128xf32>
    %1 = vector.multi_reduction <add>, %0, %cst [1] : vector<1x4x128xf32> to vector<1x128xf32>
    %2 = vector.shape_cast %1 : vector<1x128xf32> to vector<1x1x128xf32>
    %cst_2 = arith.constant 4.000000e+00 : f32
    %3 = vector.broadcast %cst_2 : f32 to vector<1x1x128xf32>
    %4 = arith.divf %2, %3 : vector<1x1x128xf32>
    %5 = vector.broadcast %4 : vector<1x1x128xf32> to vector<1x4x128xf32>
    %6 = arith.subf %0, %5 : vector<1x4x128xf32>
    %7 = arith.mulf %6, %6 : vector<1x4x128xf32>
    %cst_3 = arith.constant dense<0.000000e+00> : vector<1x128xf32>
    %8 = vector.multi_reduction <add>, %7, %cst_3 [1] : vector<1x4x128xf32> to vector<1x128xf32>
    %9 = vector.shape_cast %8 : vector<1x128xf32> to vector<1x1x128xf32>
    %cst_4 = arith.constant 3.000000e+00 : f32
    %10 = vector.broadcast %cst_4 : f32 to vector<1x1x128xf32>
    %11 = arith.divf %9, %10 : vector<1x1x128xf32>
    %cst_5 = arith.constant 9.99999974E-6 : f32
    %12 = vector.broadcast %cst_5 : f32 to vector<1x1x128xf32>
    %13 = arith.addf %11, %12 : vector<1x1x128xf32>
    %14 = math.rsqrt %13 : vector<1x1x128xf32>
    %c0_6 = arith.constant 0 : index
    %c0_7 = arith.constant 0 : index
    %15 = vector.load %arg2[%c0_6, %c0_7] : memref<4x1xf32, #tpu.memory_space<vmem>>, vector<4x1xf32>
    %c0_8 = arith.constant 0 : index
    %c0_9 = arith.constant 0 : index
    %16 = vector.load %arg3[%c0_8, %c0_9] : memref<4x1xf32, #tpu.memory_space<vmem>>, vector<4x1xf32>
    %17 = vector.broadcast %14 : vector<1x1x128xf32> to vector<1x4x128xf32>
    %18 = arith.mulf %6, %17 : vector<1x4x128xf32>
    %19 = vector.shape_cast %15 : vector<4x1xf32> to vector<1x4x1xf32>
    %20 = vector.broadcast %19 : vector<1x4x1xf32> to vector<1x4x128xf32>
    %21 = arith.mulf %20, %18 : vector<1x4x128xf32>
    %22 = vector.shape_cast %16 : vector<4x1xf32> to vector<1x4x1xf32>
    %23 = vector.broadcast %22 : vector<1x4x1xf32> to vector<1x4x128xf32>
    %24 = arith.addf %21, %23 : vector<1x4x128xf32>
    %c0_10 = arith.constant 0 : index
    %c0_11 = arith.constant 0 : index
    %c0_12 = arith.constant 0 : index
    %25 = vector.load %arg5[%c0_10, %c0_11, %c0_12] : memref<1x4x128xf32, #tpu.memory_space<vmem>>, vector<1x4x128xf32>
    tpu.vector_store %arg5[%c0_10, %c0_11, %c0_12], %24 {strides = array<i32>} : memref<1x4x128xf32, #tpu.memory_space<vmem>>, vector<1x4x128xf32>,
    return
  }
  func.func @transform_0(%arg0: i32, %arg1: i32) -> (i32, i32) {
    %c0_i32 = arith.constant 0 : i32
    %c0_i32_0 = arith.constant 0 : i32
    %c0_i32_1 = arith.constant 0 : i32
    return %c0_i32, %c0_i32_0 : i32, i32
  }
  func.func @transform_1(%arg0: i32, %arg1: i32) -> (i32, i32) {
    %c0_i32 = arith.constant 0 : i32
    %c0_i32_0 = arith.constant 0 : i32
    %c0_i32_1 = arith.constant 0 : i32
    return %c0_i32, %c0_i32_0 : i32, i32
  }
  func.func @transform_2(%arg0: i32, %arg1: i32) -> (i32, i32, i32) {
    %c0_i32 = arith.constant 0 : i32
    %c0_i32_0 = arith.constant 0 : i32
    return %arg1, %c0_i32, %arg0 : i32, i32, i32
  }
  func.func @transform_3(%arg0: i32, %arg1: i32) -> (i32, i32, i32) {
    %c0_i32 = arith.constant 0 : i32
    %c0_i32_0 = arith.constant 0 : i32
    return %arg1, %c0_i32, %arg0 : i32, i32, i32
  }
}

</mosaic_0001>

<bundles_post_ra>
// kernel: tpu_custom_call.1
= control target key start
LH: loop header
LB: loop body
LE: loop exit
PB: predicated region body
PF: predicated region fallthrough
CT: control target
= control target key end

     0   :  { %8 = vsyncpa [#allocation3], 0  ;;  %s677_s0 = inlined_call_operand.vmem [shape: f32[4,1], index: 0, kind: input, shape index: {}]   ;;  %s678_s1 = inlined_call_operand.vmem [shape: f32[4,1], index: 1, kind: input, shape index: {}]   ;;  %s679_s2 = inlined_call_operand.vmem [shape: f32[2,4,256], index: 2, kind: input, shape index: {}]   ;;  %s680_s3 = inlined_call_operand.hbm [shape: f32[2,4,256], index: 3, kind: output, shape index: {}]  }
   0x1   :  { %10 = vsyncpa [#allocation3 + $0x1], 0  ;;  %s534_s12 = smov 0   ;;  %s536_s13 = smov 0  }
   0x2   :  { %s538_s14 = smov 0   ;;  %s540_s15 = smov 0  }
   0x3   :  { %s542_s16 = smov 0   ;;  %s544_s17 = smov 0  }
   0x4   :  { %s546_s18 = smov 0   ;;  %s548_s19 = smov 0  }
   0x5 LB: > { %s328_s20 = sadd.s32 4294967295, %s510_s19   ;;  %s329_s21 = sadd.s32 4294967294, %s510_s19   ;;  %s510_s19 = sphi %s548_s19, %s16_s19   ;;  %s506_s18 = sphi %s546_s18, %s689_s18   ;;  %s502_s17 = sphi %s544_s17, %s688_s17   ;;  %s498_s16 = sphi %s542_s16, %s687_s16   ;;  %s494_s15 = sphi %s540_s15, %s686_s15   ;;  %s490_s14 = sphi %s538_s14, %s685_s14   ;;  %s486_s13 = sphi %s536_s13, %s684_s13   ;;  %s482_s12 = sphi %s534_s12, %s683_s12  }
   0x6   : > { %s25_s22 = sadd.s32 1, %s502_s17  ;;  %s28_s23 = sadd.s32 1, %s506_s18 }
   0x7   : > { %p26_p0 = scmp.ge.s32.totalorder %s25_s22, 2  ;;  %p117_p1 = scmp.ne.s32.totalorder %s490_s14, %s486_s13 }
   0x8   : > { %p118_p2 = scmp.eq.s32.totalorder %s328_s20, 3  ;;  %p123_p5 = scmp.ne.s32.totalorder %s486_s13, %s482_s12 }
   0x9   : > { %s691_s22 = smov (%p26_p0, %s25_s22), 0  ;;  %s693_s23 = smov (!%p26_p0, %s28_s23), %s506_s18 }
   0xa   : > { %s102_s24 = ssub.s32 %s502_s17, %s691_s22  ;;  %p585_p3 = por %p118_p2, %p117_p1 }
   0xb   : > { %p30_p4 = scmp.ge.s32.totalorder %s693_s23, 2  ;;  %p124_p6 = scmp.eq.s32.totalorder %s329_s21, 3 }
   0xc   : > { %p332_p7 = scmp.ge.s32.totalorder %s510_s19, 1  ;;  %p159_p9 = scmp.lt.s32.totalorder %s510_s19, 5 }
   0xd   : > { %s695_s23 = smov (%p30_p4, %s693_s23), 0  ;;  %p594_p8 = por %p124_p6, %p123_p5 }
   0xe   : > { %s103_s27 = ssub.s32 %s506_s18, %s695_s23  ;;  %s107_s28 = sadd.s32 1, %s490_s14 }
   0xf   : > { %s104_s29 = sor.u32 %s103_s27, %s102_s24  ;;  %p160_p10 = pnand %p332_p7, %p159_p9 }
  0x10   : > { %p105_p11 = scmp.eq.s32.totalorder %s104_s29, 0  ;;  %v218_v0 = vld [vmem:[%s677_s0] sm:$0xf] (!%p160_p10)  ;;  %v512_v1 = vmov (!%p160_p10), 0   ;;  %p186_p12 = scmp.lt.s32.totalorder (!%p160_p10), %s494_s15, 1  ;;  %vm195_vm0 = vcmask (!%p160_p10), 1043456  }
  0x11   : > { %163 = sbr.rel (%p160_p10) target bundleno = 167 (0xa7), region = 32  ;;  %413 = vset.pattern.permute.xlu0 (!%p160_p10), %v512_v1  ;;  %v219_v2 = vld [vmem:[%s678_s1] sm:$0xf] (!%p160_p10)  ;;  %p188_p13 = scmp.lt.s32.totalorder (!%p160_p10), %s498_s16, 1 }
  0x12   : > { %s603_s30 = scalar_select %p105_p11, %s490_s14, %s107_s28  }
  0x13   : > { %223 = vperm.xlu0 (!%p160_p10), %413, %v218_v0   ;;  %s183_s28 = sand.u32 (!%p160_p10), 1, %s486_s13   ;;  %s337_s4 = sshll.u32 (!%p160_p10), %s494_s15, 1 }
  0x14   : > { %s333_s29 = sshll.u32 (!%p160_p10), %s183_s28, 2  ;;  %s246_s5 = sadd.s32 (!%p160_p10), %s498_s16, %s337_s4 }
  0x15   : > { %s338_s6 = sshll.u32 (!%p160_p10), %s246_s5, 6  ;;  %s185_s7 = scalar_lea.vmem (!%p160_p10), [#allocation2], %s333_s29 }
  0x17   : > { %229 = vperm.xlu0 (!%p160_p10), %413, %v219_v2  }
  0x18   : > { %s187_s8 = scalar_select %p186_p12, %s494_s15, 1 }
  0x19   : > { %s189_s9 = scalar_select %p188_p13, %s498_s16, 1 }
  0x1a   : > { %s334_s10 = sshll.u32 %s187_s8, 1  ;;  %s250_s8 = sshll.u32 %s185_s7, 4  ;;  %s626_s8 = int_to_ptr.vmem [resolvable:$true] %s250_s8 }
  0x1b   : > { %s191_s11 = sadd.s32 %s334_s10, %s189_s9  ;;  %s235_s15 = scalar_lea.sflag [#allocation3], %s183_s28 }
  0x1c   : > { %s335_s20 = sshll.u32 %s191_s11, 2  ;;  %s624_s11 = scalar_lea.hbm %s680_s3, %s338_s6 }
  0x1d   : > { %s193_s27 = scalar_lea.vmem %s679_s2, %s335_s20  ;;  %s416_s16 = scalar_lea.vmem %s626_s8, 64 }
  0x1e   : > { %v194_v3 = vld [vmem:[%s193_s27] sm:$0xf]  ;;  %p417_p0 = scmp.ne.s32.totalorder %s626_s8, %s416_s16  ;;  %s513_s20 = smov [#allocation2]  }
  0x1f   : > { %v196_v4 = vsel %vm195_vm0, %v194_v3, 0.0  ;;  %s420_s21 = sshll.u32 %s513_s20, 4  ;;  %s421_s21 = int_to_ptr.vmem [resolvable:$false] %s420_s21 }
  0x20   : > { %v197_v5 = vrot.slane %v196_v4, 4  ;;  %p418_p1 = pnand %p417_p0, %p585_p3  ;;  %s422_s24 = scalar_lea.vmem %s421_s21, 128 }
  0x21   : > { %p423_p4 = scmp.lt.s32.totalorder %s626_s8, %s421_s21  ;;  %p424_p5 = scmp.lt.s32.totalorder %s422_s24, %s416_s16 }
  0x22   : > { %v198_v6 = vadd.f32 %v197_v5, %v196_v4  ;;  %p419_p2 = pneg %p418_p1 }
  0x23   : > { %p425_p6 = por %p424_p5, %p423_p4 }
  0x24   : > { %v199_v7 = vrot.slane %v198_v6, 2 }
  0x25   : > { %p426_p7 = pnand %p425_p6, %p419_p2 }
  0x26   : > { %v200_v8 = vadd.f32 %v199_v7, %v198_v6 }
  0x28   : > { %v201_v9 = vrot.slane %v200_v8, 1 }
  0x2a   : > { %v202_v10 = vadd.f32 %v201_v9, %v200_v8 }
  0x2c   : > { %v204_v11 = vmul.f32 0.25, %v202_v10 }
  0x2e   : > { %v205_v12 = vsub.f32 %v194_v3, %v204_v11 }
  0x30   : > { %v206_v13 = vmul.f32 %v205_v12, %v205_v12 }
  0x32   : > { %v207_v14 = vsel %vm195_vm0, %v206_v13, 0.0 }
  0x33   : > { %v208_v15 = vrot.slane %v207_v14, 4 }
  0x35   : > { %v209_v16 = vadd.f32 %v208_v15, %v207_v14 }
  0x37   : > { %v210_v17 = vrot.slane %v209_v16, 2 }
  0x39   : > { %v211_v18 = vadd.f32 %v210_v17, %v209_v16 }
  0x3b   : > { %v212_v19 = vrot.slane %v211_v18, 1 }
  0x3d   : > { %v213_v20 = vadd.f32 %v212_v19, %v211_v18 }
  0x3f   : > { %v215_v21 = vmul.f32 0.33333334, %v213_v20 }
  0x41   : > { %v216_v22 = vadd.f32 1e-05, %v215_v21 }
  0x43   : > { %414 = vrsqrt.f32 %v216_v22 }
  0x4d   : > { %v415_v23 = vpop.eup %414 }
  0x4e   : > { %v220_v24 = vmul.f32 %v415_v23, %v205_v12 }
  0x92   : > { %v224_v25 = vpop.permute.xlu0 %223 }
  0x93   : > { %v226_v26 = vmul.f32 %v224_v25, %v220_v24 }
  0x96   : > { %v230_v27 = vpop.permute.xlu0 %229 }
  0x97   : > { %v232_v28 = vadd.f32 %v230_v27, %v226_v26 }
  0x99   : > { %233 = vst [vmem:[%s185_s7] sm:$0xf] %v232_v28 }
  0x9a   : > { %429 = shalt.err (!%p426_p7)
}
  0x9b   : > { %s430_s27 = scalar_lea.hbm %s624_s11, 64  ;;  %s434_s4 = scalar_lea.hbm %s680_s3, 256 }
  0x9c   : > { %p431_p9 = scmp.ne.s32.totalorder %s624_s11, %s430_s27  ;;  %p435_p12 = scmp.lt.u32.totalorder %s624_s11, %s680_s3 }
  0x9d   : > { %p436_p13 = scmp.lt.u32.totalorder %s434_s4, %s430_s27  ;;  %p438_p1 = scmp.lt.u32.totalorder %s430_s27, %s624_s11 }
  0x9e   : > { %p432_p10 = pnand %p431_p9, %p585_p3 }
  0x9f   : > { %p437_p0 = por %p436_p13, %p435_p12 }
  0xa0   : > { %p433_p11 = pneg %p432_p10 }
  0xa1   : > { %p439_p2 = por %p438_p1, %p437_p0 }
  0xa3   : > { %p440_p4 = pnand %p439_p2, %p433_p11 }
  0xa5   : > { %443 = shalt.err (!%p440_p4)
}
  0xa6   : > { %341 = dma.vmem_to_hbm [thread:$0]  (%p585_p3), %s626_s8, 64, %s624_s11, %s235_s15  }
  0xa7 PF: > { %p347_p5 = scmp.ge.s32.totalorder %s510_s19, 2  ;;  %s262_s7 = sand.u32 1, %s482_s12  }
  0xa8   : > { %s263_s9 = scalar_lea.sflag [#allocation3], %s262_s7 }
  0xa9   : > { %p344_p6 = pnand %p347_p5, %p594_p8 }
  0xab   : > { %477 = dma.done.wait (!%p344_p6), %s263_s9, 64  }
  0xac   : > { %479 = vsyncadd (!%p344_p6), %s263_s9, 4294967232  ;;  %s16_s19 = sadd.s32 1, %s510_s19   ;;  %s683_s12 = smov %s486_s13 }
  0xad   : > { %p13_p7 = scmp.ge.s32.totalorder %s16_s19, 6   ;;  %s684_s13 = smov %s490_s14 }
  0xae   : > { %s685_s14 = smov %s603_s30  ;;  %s686_s15 = smov %s502_s17 }
  0xaf   : > { %s687_s16 = smov %s506_s18  ;;  %s688_s17 = smov %s691_s22 }
  0xb0   : > { %s689_s18 = smov %s695_s23  ;;  %15 = sbr.rel (!%p13_p7) target bundleno = 5 (0x5), region = 67 }
  0xb7   :  { %268 = vsyncpa [#allocation3], 1 }
  0xb8   :  { %270 = vsyncpa [#allocation3 + $0x1], 1 }

</bundles_post_ra>
